<compile_context>
chip_gen: v7x
topology: tpu7x:2x2x1
jax: 0.10.0
libtpu: 0.0.40
codegen_flags: <defaults>
</compile_context>

<pallas_src>
import functools
import math

import jax
import jax.numpy as jnp
from jax.experimental import pallas as pl
from jax.experimental.pallas import tpu as pltpu


def _round_up(x, m):
    return -(-x // m) * m


# --- elementwise loss terms (pure VPU) -----------------------------------------
def _one_minus_sq(x):          # (1 - x)^2
    d = 1.0 - x
    return d * d


def _sq(x):                    # x^2
    return x * x


def _abs_diff(a, b):           # |a - b|
    return jnp.abs(a - b)


# --- kernel ----------------------------------------------------------------------
def _fused_sum_kernel(metas, n_tensors, n_out, *refs):
    """metas: static list of (n_in, elem_fn, weight, out_idx).

    refs layout: [hbm inputs] + [smem out] + [vmem bufs] + [dma sem array].
    For every input tensor: DMA HBM -> VMEM (all issued up front so later
    copies overlap earlier compute), cast to f32, apply its elementwise term,
    reduce to a scalar, scale by its 1/n (or 2/n) weight, accumulate in
    registers, and write one SMEM scalar per loss term at the end.
    """
    in_refs = refs[:n_tensors]
    out_ref = refs[n_tensors]
    bufs = refs[n_tensors + 1: n_tensors + 1 + n_tensors]
    sem = refs[n_tensors + 1 + n_tensors]

    copies = []
    for t in range(n_tensors):
        cp = pltpu.make_async_copy(in_refs[t], bufs[t], sem.at[t])
        cp.start()
        copies.append(cp)

    totals = [jnp.float32(0.0) for _ in range(n_out)]
    t = 0
    for n_in, elem_fn, weight, out_idx in metas:
        args = []
        for _ in range(n_in):
            copies[t].wait()
            args.append(bufs[t][...].astype(jnp.float32))
            t += 1
        val = jnp.sum(elem_fn(*args)) * jnp.float32(weight)
        totals[out_idx] = totals[out_idx] + val

    for k in range(n_out):
        out_ref[0, k] = totals[k]


# --- wrapper: one pallas_call per loss mode --------------------------------------
def _fused_weighted_means(items, n_out):
    """items: list of (arrays_tuple, elem_fn, weight, out_idx).

    One pallas_call total.  Returns n_out f32 scalars:
        out[k] = sum over items with out_idx == k of weight * sum(elem_fn(*arrays)).
    """
    tensors, metas = [], []
    for arrs, elem_fn, weight, out_idx in items:
        arrs = tuple(jnp.asarray(a) for a in arrs)
        # Mosaic prefers >=2-D operands; promote the (rare) degenerate ranks.
        arrs = tuple(a.reshape(1, -1) if a.ndim < 2 else a for a in arrs)
        tensors.extend(arrs)
        metas.append((len(arrs), elem_fn, float(weight), out_idx))

    n_tensors = len(tensors)
    kernel = functools.partial(_fused_sum_kernel, metas, n_tensors, n_out)

    scratch = [pltpu.VMEM(t.shape, t.dtype) for t in tensors]
    scratch.append(pltpu.SemaphoreType.DMA((n_tensors,)))

    # Layout-padded VMEM footprint of the scratch buffers; only raise the
    # scoped VMEM limit when the per-generation defaults would be exceeded.
    vmem_bytes = 0
    for t in tensors:
        itemsize = jnp.dtype(t.dtype).itemsize
        shp = list(t.shape)
        shp[-1] = _round_up(shp[-1], 128)
        shp[-2] = _round_up(shp[-2], max(8, 32 // itemsize))
        vmem_bytes += math.prod(shp) * itemsize
    compiler_params = None
    if vmem_bytes > 12 * 1024 * 1024:
        # TODO(synk): for footprints approaching physical VMEM (64 MiB on v7x),
        # chunk large tensors through a double-buffered streaming loop (and on
        # v7x split the static item list across both TensorCores) instead of
        # only raising the scoped limit.
        compiler_params = pltpu.CompilerParams(
            vmem_limit_bytes=int(min(vmem_bytes + (8 << 20), 128 << 20)))

    out = pl.pallas_call(
        kernel,
        out_shape=jax.ShapeDtypeStruct((1, n_out), jnp.float32),
        in_specs=[pl.BlockSpec(memory_space=pl.ANY)] * n_tensors,
        out_specs=pl.BlockSpec(memory_space=pltpu.SMEM),
        scratch_shapes=scratch,
        compiler_params=compiler_params,
    )(*tensors)
    return [out[0, k] for k in range(n_out)]


# --- module forward ----------------------------------------------------------------
def discriminator_loss_forward(mrd_real, mrd_fake, fmap_real, fmap_fake,
                               generator=False):
    if not generator:
        # disc_loss = sum_i [ mean((1 - dr_i)^2) + mean(dg_i^2) ]   (one launch)
        assert len(mrd_real) == len(mrd_fake)
        items = []
        for dr, dg in zip(mrd_real, mrd_fake):
            items.append(((dr,), _one_minus_sq, 1.0 / dr.size, 0))
            items.append(((dg,), _sq, 1.0 / dg.size, 0))
        (disc_loss,) = _fused_weighted_means(items, 1)
        return {'disc_loss': disc_loss}

    # One launch for BOTH generator-mode terms:
    #   fmap_loss = 2 * sum_layers mean(|rl - gl|)   -> output column 0
    #   gen_loss  = sum_i mean((1 - dg_i)^2)         -> output column 1
    items = []
    for dr_maps, dg_maps in zip(fmap_real, fmap_fake):
        for rl, gl in zip(dr_maps, dg_maps):
            assert rl.shape == gl.shape, "feature-map pair shape mismatch"
            items.append(((rl, gl), _abs_diff, 2.0 / rl.size, 0))
    for dg in mrd_fake:
        items.append(((dg,), _one_minus_sq, 1.0 / dg.size, 1))
    fmap_loss, gen_loss = _fused_weighted_means(items, 2)
    return {'gen_loss': gen_loss, 'fmap_loss': fmap_loss}


# --- pure-JAX reference (sanity check) -----------------------------------------------
def _reference(mrd_real, mrd_fake, fmap_real, fmap_fake, generator=False):
    if not generator:
        loss = 0.0
        for dr, dg in zip(mrd_real, mrd_fake):
            loss = loss + jnp.mean((1.0 - dr) ** 2) + jnp.mean(dg ** 2)
        return {'disc_loss': loss}
    fmap = 0.0
    for dr, dg in zip(fmap_real, fmap_fake):
        for rl, gl in zip(dr, dg):
            fmap = fmap + jnp.mean(jnp.abs(rl - gl))
    fmap = fmap * 2.0
    gen = 0.0
    for dg in mrd_fake:
        gen = gen + jnp.mean((1.0 - dg) ** 2)
    return {'gen_loss': gen, 'fmap_loss': fmap}


if __name__ == "__main__":
    key = jax.random.PRNGKey(0)

    # Synthetic MRD discriminator outputs: 3 sub-discriminators, (B, 1, T).
    mrd_shapes = [(2, 1, 40), (2, 1, 24), (2, 1, 16)]
    # Feature maps per sub-discriminator: NCHW (torch conv convention).
    fmap_shapes = [
        [(2, 4, 16, 8), (2, 8, 32, 16)],
        [(2, 4, 12, 8), (2, 8, 12, 8)],
        [(2, 4, 8, 8), (2, 8, 8, 8)],
    ]

    keys = jax.random.split(key, 64)
    ki = iter(range(64))

    mrd_real = [jax.random.normal(keys[next(ki)], s, jnp.float32) for s in mrd_shapes]
    mrd_fake = [jax.random.normal(keys[next(ki)], s, jnp.float32) for s in mrd_shapes]
    fmap_real = [[jax.random.normal(keys[next(ki)], s, jnp.float32) for s in group]
                 for group in fmap_shapes]
    fmap_fake = [[jax.random.normal(keys[next(ki)], s, jnp.float32) for s in group]
                 for group in fmap_shapes]

    # Discriminator mode (1 fused kernel launch).
    out_d = discriminator_loss_forward(mrd_real, mrd_fake, fmap_real, fmap_fake,
                                       generator=False)
    jax.block_until_ready(out_d['disc_loss'])

    # Generator mode (1 fused kernel launch for fmap + gen terms).
    out_g = discriminator_loss_forward(mrd_real, mrd_fake, fmap_real, fmap_fake,
                                       generator=True)
    jax.block_until_ready(out_g['gen_loss'])
    jax.block_until_ready(out_g['fmap_loss'])

    # Sanity check vs pure-JAX reference.
    ref_d = _reference(mrd_real, mrd_fake, fmap_real, fmap_fake, generator=False)
    ref_g = _reference(mrd_real, mrd_fake, fmap_real, fmap_fake, generator=True)
    assert jnp.allclose(out_d['disc_loss'], ref_d['disc_loss'], atol=1e-4, rtol=1e-4)
    assert jnp.allclose(out_g['gen_loss'], ref_g['gen_loss'], atol=1e-4, rtol=1e-4)
    assert jnp.allclose(out_g['fmap_loss'], ref_g['fmap_loss'], atol=1e-4, rtol=1e-4)

    print("KERNEL_OK")
</pallas_src>

<mosaic_0001>
module attributes {stable_mosaic.version = 11 : i64} {
  func.func @_fused_sum_kernel(%arg0: memref<2x1x40xf32, #tpu.memory_space<any>>, %arg1: memref<2x1x40xf32, #tpu.memory_space<any>>, %arg2: memref<2x1x24xf32, #tpu.memory_space<any>>, %arg3: memref<2x1x24xf32, #tpu.memory_space<any>>, %arg4: memref<2x1x16xf32, #tpu.memory_space<any>>, %arg5: memref<2x1x16xf32, #tpu.memory_space<any>>, %arg6: memref<1x1xf32, #tpu.memory_space<smem>>, %arg7: memref<2x1x40xf32, #tpu.memory_space<vmem>>, %arg8: memref<2x1x40xf32, #tpu.memory_space<vmem>>, %arg9: memref<2x1x24xf32, #tpu.memory_space<vmem>>, %arg10: memref<2x1x24xf32, #tpu.memory_space<vmem>>, %arg11: memref<2x1x16xf32, #tpu.memory_space<vmem>>, %arg12: memref<2x1x16xf32, #tpu.memory_space<vmem>>, %arg13: memref<6x!tpu.dma_semaphore, #tpu.memory_space<semaphore_mem>>) attributes {dimension_semantics = [], scalar_prefetch = 0 : i64, scratch_operands = 7 : i64, tpu.core_type = #tpu.core_type<tc>} {
    %c0_i32 = arith.constant 0 : i32
    %0 = tpu.memref_slice %arg13[%c0_i32] : memref<6x!tpu.dma_semaphore, #tpu.memory_space<semaphore_mem>> -> memref<1x!tpu.dma_semaphore, #tpu.memory_space<semaphore_mem>>
    %1 = tpu.memref_squeeze %0 : memref<1x!tpu.dma_semaphore, #tpu.memory_space<semaphore_mem>> -> memref<!tpu.dma_semaphore, #tpu.memory_space<semaphore_mem>>
    tpu.enqueue_dma source(%arg0 : memref<2x1x40xf32, #tpu.memory_space<any>>) target(%arg7 : memref<2x1x40xf32, #tpu.memory_space<vmem>>) target_semaphore(%1 : memref<!tpu.dma_semaphore, #tpu.memory_space<semaphore_mem>>)
    %c1_i32 = arith.constant 1 : i32
    %2 = tpu.memref_slice %arg13[%c1_i32] : memref<6x!tpu.dma_semaphore, #tpu.memory_space<semaphore_mem>> -> memref<1x!tpu.dma_semaphore, #tpu.memory_space<semaphore_mem>>
    %3 = tpu.memref_squeeze %2 : memref<1x!tpu.dma_semaphore, #tpu.memory_space<semaphore_mem>> -> memref<!tpu.dma_semaphore, #tpu.memory_space<semaphore_mem>>
    tpu.enqueue_dma source(%arg1 : memref<2x1x40xf32, #tpu.memory_space<any>>) target(%arg8 : memref<2x1x40xf32, #tpu.memory_space<vmem>>) target_semaphore(%3 : memref<!tpu.dma_semaphore, #tpu.memory_space<semaphore_mem>>)
    %c2_i32 = arith.constant 2 : i32
    %4 = tpu.memref_slice %arg13[%c2_i32] : memref<6x!tpu.dma_semaphore, #tpu.memory_space<semaphore_mem>> -> memref<1x!tpu.dma_semaphore, #tpu.memory_space<semaphore_mem>>
    %5 = tpu.memref_squeeze %4 : memref<1x!tpu.dma_semaphore, #tpu.memory_space<semaphore_mem>> -> memref<!tpu.dma_semaphore, #tpu.memory_space<semaphore_mem>>
    tpu.enqueue_dma source(%arg2 : memref<2x1x24xf32, #tpu.memory_space<any>>) target(%arg9 : memref<2x1x24xf32, #tpu.memory_space<vmem>>) target_semaphore(%5 : memref<!tpu.dma_semaphore, #tpu.memory_space<semaphore_mem>>)
    %c3_i32 = arith.constant 3 : i32
    %6 = tpu.memref_slice %arg13[%c3_i32] : memref<6x!tpu.dma_semaphore, #tpu.memory_space<semaphore_mem>> -> memref<1x!tpu.dma_semaphore, #tpu.memory_space<semaphore_mem>>
    %7 = tpu.memref_squeeze %6 : memref<1x!tpu.dma_semaphore, #tpu.memory_space<semaphore_mem>> -> memref<!tpu.dma_semaphore, #tpu.memory_space<semaphore_mem>>
    tpu.enqueue_dma source(%arg3 : memref<2x1x24xf32, #tpu.memory_space<any>>) target(%arg10 : memref<2x1x24xf32, #tpu.memory_space<vmem>>) target_semaphore(%7 : memref<!tpu.dma_semaphore, #tpu.memory_space<semaphore_mem>>)
    %c4_i32 = arith.constant 4 : i32
    %8 = tpu.memref_slice %arg13[%c4_i32] : memref<6x!tpu.dma_semaphore, #tpu.memory_space<semaphore_mem>> -> memref<1x!tpu.dma_semaphore, #tpu.memory_space<semaphore_mem>>
    %9 = tpu.memref_squeeze %8 : memref<1x!tpu.dma_semaphore, #tpu.memory_space<semaphore_mem>> -> memref<!tpu.dma_semaphore, #tpu.memory_space<semaphore_mem>>
    tpu.enqueue_dma source(%arg4 : memref<2x1x16xf32, #tpu.memory_space<any>>) target(%arg11 : memref<2x1x16xf32, #tpu.memory_space<vmem>>) target_semaphore(%9 : memref<!tpu.dma_semaphore, #tpu.memory_space<semaphore_mem>>)
    %c5_i32 = arith.constant 5 : i32
    %10 = tpu.memref_slice %arg13[%c5_i32] : memref<6x!tpu.dma_semaphore, #tpu.memory_space<semaphore_mem>> -> memref<1x!tpu.dma_semaphore, #tpu.memory_space<semaphore_mem>>
    %11 = tpu.memref_squeeze %10 : memref<1x!tpu.dma_semaphore, #tpu.memory_space<semaphore_mem>> -> memref<!tpu.dma_semaphore, #tpu.memory_space<semaphore_mem>>
    tpu.enqueue_dma source(%arg5 : memref<2x1x16xf32, #tpu.memory_space<any>>) target(%arg12 : memref<2x1x16xf32, #tpu.memory_space<vmem>>) target_semaphore(%11 : memref<!tpu.dma_semaphore, #tpu.memory_space<semaphore_mem>>)
    %c0_i32_0 = arith.constant 0 : i32
    %12 = tpu.memref_slice %arg13[%c0_i32_0] : memref<6x!tpu.dma_semaphore, #tpu.memory_space<semaphore_mem>> -> memref<1x!tpu.dma_semaphore, #tpu.memory_space<semaphore_mem>>
    %13 = tpu.memref_squeeze %12 : memref<1x!tpu.dma_semaphore, #tpu.memory_space<semaphore_mem>> -> memref<!tpu.dma_semaphore, #tpu.memory_space<semaphore_mem>>
    tpu.wait_dma2 semaphore(%13 : memref<!tpu.dma_semaphore, #tpu.memory_space<semaphore_mem>>) src(%arg0 : memref<2x1x40xf32, #tpu.memory_space<any>>) dst(%arg7 : memref<2x1x40xf32, #tpu.memory_space<vmem>>)
    %c0 = arith.constant 0 : index
    %c0_1 = arith.constant 0 : index
    %c0_2 = arith.constant 0 : index
    %14 = vector.load %arg7[%c0, %c0_1, %c0_2] : memref<2x1x40xf32, #tpu.memory_space<vmem>>, vector<2x1x40xf32>
    %cst = arith.constant 1.000000e+00 : f32
    %15 = vector.broadcast %cst : f32 to vector<2x1x40xf32>
    %16 = arith.subf %15, %14 : vector<2x1x40xf32>
    %17 = arith.mulf %16, %16 : vector<2x1x40xf32>
    %18 = vector.shape_cast %17 : vector<2x1x40xf32> to vector<1x2x1x40xf32>
    %cst_3 = arith.constant dense<0.000000e+00> : vector<1xf32>
    %19 = vector.multi_reduction <add>, %18, %cst_3 [1, 2, 3] : vector<1x2x1x40xf32> to vector<1xf32>
    %20 = vector.shape_cast %19 : vector<1xf32> to vector<1x1x1x1xf32>
    %21 = vector.extract %20[0, 0, 0, 0] : f32 from vector<1x1x1x1xf32>
    %cst_4 = arith.constant 1.250000e-02 : f32
    %22 = arith.mulf %21, %cst_4 : f32
    %cst_5 = arith.constant 0.000000e+00 : f32
    %23 = arith.addf %cst_5, %22 : f32
    %c1_i32_6 = arith.constant 1 : i32
    %24 = tpu.memref_slice %arg13[%c1_i32_6] : memref<6x!tpu.dma_semaphore, #tpu.memory_space<semaphore_mem>> -> memref<1x!tpu.dma_semaphore, #tpu.memory_space<semaphore_mem>>
    %25 = tpu.memref_squeeze %24 : memref<1x!tpu.dma_semaphore, #tpu.memory_space<semaphore_mem>> -> memref<!tpu.dma_semaphore, #tpu.memory_space<semaphore_mem>>
    tpu.wait_dma2 semaphore(%25 : memref<!tpu.dma_semaphore, #tpu.memory_space<semaphore_mem>>) src(%arg1 : memref<2x1x40xf32, #tpu.memory_space<any>>) dst(%arg8 : memref<2x1x40xf32, #tpu.memory_space<vmem>>)
    %c0_7 = arith.constant 0 : index
    %c0_8 = arith.constant 0 : index
    %c0_9 = arith.constant 0 : index
    %26 = vector.load %arg8[%c0_7, %c0_8, %c0_9] : memref<2x1x40xf32, #tpu.memory_space<vmem>>, vector<2x1x40xf32>
    %27 = arith.mulf %26, %26 : vector<2x1x40xf32>
    %28 = vector.shape_cast %27 : vector<2x1x40xf32> to vector<1x2x1x40xf32>
    %cst_10 = arith.constant dense<0.000000e+00> : vector<1xf32>
    %29 = vector.multi_reduction <add>, %28, %cst_10 [1, 2, 3] : vector<1x2x1x40xf32> to vector<1xf32>
    %30 = vector.shape_cast %29 : vector<1xf32> to vector<1x1x1x1xf32>
    %31 = vector.extract %30[0, 0, 0, 0] : f32 from vector<1x1x1x1xf32>
    %cst_11 = arith.constant 1.250000e-02 : f32
    %32 = arith.mulf %31, %cst_11 : f32
    %33 = arith.addf %23, %32 : f32
    %c2_i32_12 = arith.constant 2 : i32
    %34 = tpu.memref_slice %arg13[%c2_i32_12] : memref<6x!tpu.dma_semaphore, #tpu.memory_space<semaphore_mem>> -> memref<1x!tpu.dma_semaphore, #tpu.memory_space<semaphore_mem>>
    %35 = tpu.memref_squeeze %34 : memref<1x!tpu.dma_semaphore, #tpu.memory_space<semaphore_mem>> -> memref<!tpu.dma_semaphore, #tpu.memory_space<semaphore_mem>>
    tpu.wait_dma2 semaphore(%35 : memref<!tpu.dma_semaphore, #tpu.memory_space<semaphore_mem>>) src(%arg2 : memref<2x1x24xf32, #tpu.memory_space<any>>) dst(%arg9 : memref<2x1x24xf32, #tpu.memory_space<vmem>>)
    %c0_13 = arith.constant 0 : index
    %c0_14 = arith.constant 0 : index
    %c0_15 = arith.constant 0 : index
    %36 = vector.load %arg9[%c0_13, %c0_14, %c0_15] : memref<2x1x24xf32, #tpu.memory_space<vmem>>, vector<2x1x24xf32>
    %cst_16 = arith.constant 1.000000e+00 : f32
    %37 = vector.broadcast %cst_16 : f32 to vector<2x1x24xf32>
    %38 = arith.subf %37, %36 : vector<2x1x24xf32>
    %39 = arith.mulf %38, %38 : vector<2x1x24xf32>
    %40 = vector.shape_cast %39 : vector<2x1x24xf32> to vector<1x2x1x24xf32>
    %cst_17 = arith.constant dense<0.000000e+00> : vector<1xf32>
    %41 = vector.multi_reduction <add>, %40, %cst_17 [1, 2, 3] : vector<1x2x1x24xf32> to vector<1xf32>
    %42 = vector.shape_cast %41 : vector<1xf32> to vector<1x1x1x1xf32>
    %43 = vector.extract %42[0, 0, 0, 0] : f32 from vector<1x1x1x1xf32>
    %cst_18 = arith.constant 0.020833334 : f32
    %44 = arith.mulf %43, %cst_18 : f32
    %45 = arith.addf %33, %44 : f32
    %c3_i32_19 = arith.constant 3 : i32
    %46 = tpu.memref_slice %arg13[%c3_i32_19] : memref<6x!tpu.dma_semaphore, #tpu.memory_space<semaphore_mem>> -> memref<1x!tpu.dma_semaphore, #tpu.memory_space<semaphore_mem>>
    %47 = tpu.memref_squeeze %46 : memref<1x!tpu.dma_semaphore, #tpu.memory_space<semaphore_mem>> -> memref<!tpu.dma_semaphore, #tpu.memory_space<semaphore_mem>>
    tpu.wait_dma2 semaphore(%47 : memref<!tpu.dma_semaphore, #tpu.memory_space<semaphore_mem>>) src(%arg3 : memref<2x1x24xf32, #tpu.memory_space<any>>) dst(%arg10 : memref<2x1x24xf32, #tpu.memory_space<vmem>>)
    %c0_20 = arith.constant 0 : index
    %c0_21 = arith.constant 0 : index
    %c0_22 = arith.constant 0 : index
    %48 = vector.load %arg10[%c0_20, %c0_21, %c0_22] : memref<2x1x24xf32, #tpu.memory_space<vmem>>, vector<2x1x24xf32>
    %49 = arith.mulf %48, %48 : vector<2x1x24xf32>
    %50 = vector.shape_cast %49 : vector<2x1x24xf32> to vector<1x2x1x24xf32>
    %cst_23 = arith.constant dense<0.000000e+00> : vector<1xf32>
    %51 = vector.multi_reduction <add>, %50, %cst_23 [1, 2, 3] : vector<1x2x1x24xf32> to vector<1xf32>
    %52 = vector.shape_cast %51 : vector<1xf32> to vector<1x1x1x1xf32>
    %53 = vector.extract %52[0, 0, 0, 0] : f32 from vector<1x1x1x1xf32>
    %cst_24 = arith.constant 0.020833334 : f32
    %54 = arith.mulf %53, %cst_24 : f32
    %55 = arith.addf %45, %54 : f32
    %c4_i32_25 = arith.constant 4 : i32
    %56 = tpu.memref_slice %arg13[%c4_i32_25] : memref<6x!tpu.dma_semaphore, #tpu.memory_space<semaphore_mem>> -> memref<1x!tpu.dma_semaphore, #tpu.memory_space<semaphore_mem>>
    %57 = tpu.memref_squeeze %56 : memref<1x!tpu.dma_semaphore, #tpu.memory_space<semaphore_mem>> -> memref<!tpu.dma_semaphore, #tpu.memory_space<semaphore_mem>>
    tpu.wait_dma2 semaphore(%57 : memref<!tpu.dma_semaphore, #tpu.memory_space<semaphore_mem>>) src(%arg4 : memref<2x1x16xf32, #tpu.memory_space<any>>) dst(%arg11 : memref<2x1x16xf32, #tpu.memory_space<vmem>>)
    %c0_26 = arith.constant 0 : index
    %c0_27 = arith.constant 0 : index
    %c0_28 = arith.constant 0 : index
    %58 = vector.load %arg11[%c0_26, %c0_27, %c0_28] : memref<2x1x16xf32, #tpu.memory_space<vmem>>, vector<2x1x16xf32>
    %cst_29 = arith.constant 1.000000e+00 : f32
    %59 = vector.broadcast %cst_29 : f32 to vector<2x1x16xf32>
    %60 = arith.subf %59, %58 : vector<2x1x16xf32>
    %61 = arith.mulf %60, %60 : vector<2x1x16xf32>
    %62 = vector.shape_cast %61 : vector<2x1x16xf32> to vector<1x2x1x16xf32>
    %cst_30 = arith.constant dense<0.000000e+00> : vector<1xf32>
    %63 = vector.multi_reduction <add>, %62, %cst_30 [1, 2, 3] : vector<1x2x1x16xf32> to vector<1xf32>
    %64 = vector.shape_cast %63 : vector<1xf32> to vector<1x1x1x1xf32>
    %65 = vector.extract %64[0, 0, 0, 0] : f32 from vector<1x1x1x1xf32>
    %cst_31 = arith.constant 3.125000e-02 : f32
    %66 = arith.mulf %65, %cst_31 : f32
    %67 = arith.addf %55, %66 : f32
    %c5_i32_32 = arith.constant 5 : i32
    %68 = tpu.memref_slice %arg13[%c5_i32_32] : memref<6x!tpu.dma_semaphore, #tpu.memory_space<semaphore_mem>> -> memref<1x!tpu.dma_semaphore, #tpu.memory_space<semaphore_mem>>
    %69 = tpu.memref_squeeze %68 : memref<1x!tpu.dma_semaphore, #tpu.memory_space<semaphore_mem>> -> memref<!tpu.dma_semaphore, #tpu.memory_space<semaphore_mem>>
    tpu.wait_dma2 semaphore(%69 : memref<!tpu.dma_semaphore, #tpu.memory_space<semaphore_mem>>) src(%arg5 : memref<2x1x16xf32, #tpu.memory_space<any>>) dst(%arg12 : memref<2x1x16xf32, #tpu.memory_space<vmem>>)
    %c0_33 = arith.constant 0 : index
    %c0_34 = arith.constant 0 : index
    %c0_35 = arith.constant 0 : index
    %70 = vector.load %arg12[%c0_33, %c0_34, %c0_35] : memref<2x1x16xf32, #tpu.memory_space<vmem>>, vector<2x1x16xf32>
    %71 = arith.mulf %70, %70 : vector<2x1x16xf32>
    %72 = vector.shape_cast %71 : vector<2x1x16xf32> to vector<1x2x1x16xf32>
    %cst_36 = arith.constant dense<0.000000e+00> : vector<1xf32>
    %73 = vector.multi_reduction <add>, %72, %cst_36 [1, 2, 3] : vector<1x2x1x16xf32> to vector<1xf32>
    %74 = vector.shape_cast %73 : vector<1xf32> to vector<1x1x1x1xf32>
    %75 = vector.extract %74[0, 0, 0, 0] : f32 from vector<1x1x1x1xf32>
    %cst_37 = arith.constant 3.125000e-02 : f32
    %76 = arith.mulf %75, %cst_37 : f32
    %77 = arith.addf %67, %76 : f32
    %c0_38 = arith.constant 0 : index
    %c0_39 = arith.constant 0 : index
    %78 = memref.load %arg6[%c0_38, %c0_39] : memref<1x1xf32, #tpu.memory_space<smem>>
    memref.store %77, %arg6[%c0_38, %c0_39] : memref<1x1xf32, #tpu.memory_space<smem>>
    return
  }
}

</mosaic_0001>

<bundles_post_ra>
// kernel: tpu_custom_call.1
= control target key start
LH: loop header
LB: loop body
LE: loop exit
PB: predicated region body
PF: predicated region fallthrough
CT: control target
= control target key end

     0   :  { %11 = vsyncpa [#allocation10], 0  ;;  %s551_s23 = smov [#allocation2]   ;;  %s639_s0 = inlined_call_operand.hbm [shape: f32[2,1,40], index: 0, kind: input, shape index: {}]   ;;  %s640_s1 = inlined_call_operand.vmem [shape: f32[2,1,40], index: 1, kind: input, shape index: {}]   ;;  %s641_s2 = inlined_call_operand.vmem [shape: f32[2,1,24], index: 2, kind: input, shape index: {}]   ;;  %s642_s3 = inlined_call_operand.vmem [shape: f32[2,1,24], index: 3, kind: input, shape index: {}]   ;;  %s643_s4 = inlined_call_operand.vmem [shape: f32[2,1,16], index: 4, kind: input, shape index: {}]   ;;  %s644_s5 = inlined_call_operand.vmem [shape: f32[2,1,16], index: 5, kind: input, shape index: {}]   ;;  %s645_s6 = inlined_call_operand.hbm [shape: f32[1,1], index: 6, kind: output, shape index: {}]  }
   0x1   :  { %v41_v0 = vld [vmem:[%s640_s1] sm:$0x3]  ;;  %s19_s24 = sshll.u32 %s551_s23, 4  ;;  %s505_s27 = scalar_lea.hbm %s639_s0, 32  ;;  %s20_s24 = int_to_ptr.vmem [resolvable:$true] %s19_s24 }
   0x2   :  { %42 = vst [vmem:[#allocation3] sm:$0x3] %v41_v0  ;;  %p506_p0 = scmp.ne.s32.totalorder %s639_s0, %s505_s27  ;;  %p509_p1 = scmp.lt.u32.totalorder %s505_s27, %s639_s0 }
   0x4   :  { %p511_p2 = pnand %p509_p1, %p506_p0 }
   0x6   :  { %514 = shalt.err (!%p511_p2)  }
   0x7   :  { %s515_s8 = scalar_lea.vmem %s20_s24, 32  ;;  %p520_p4 = scmp.lt.s32.totalorder %s20_s24, %s20_s24 }
   0x8   :  { %p516_p3 = scmp.ne.s32.totalorder %s20_s24, %s515_s8  ;;  %p521_p5 = scmp.lt.s32.totalorder %s515_s8, %s515_s8 }
   0xa   :  { %p522_p6 = por %p521_p5, %p520_p4 }
   0xc   :  { %p523_p7 = pnand %p522_p6, %p516_p3 }
   0xe   :  { %526 = shalt.err (!%p523_p7)  }
   0xf   :  { %22 = dma.hbm_to_vmem [thread:$0]  %s639_s0, 32, %s20_s24, [#allocation8] }
  0x10   :  { %67 = vsyncadd [#allocation8 + $0x1], 32  ;;  %v86_v1 = vld [vmem:[%s641_s2] sm:$0x3] }
  0x11   :  { %87 = vst [vmem:[#allocation4] sm:$0x3] %v86_v1 }
  0x12   :  { %112 = vsyncadd [#allocation8 + $0x2], 32  ;;  %v131_v2 = vld [vmem:[%s642_s3] sm:$0x3] }
  0x13   :  { %132 = vst [vmem:[#allocation5] sm:$0x3] %v131_v2 }
  0x14   :  { %157 = vsyncadd [#allocation8 + $0x3], 32  ;;  %v176_v3 = vld [vmem:[%s643_s4] sm:$0x3] }
  0x15   :  { %177 = vst [vmem:[#allocation6] sm:$0x3] %v176_v3 }
  0x16   :  { %202 = vsyncadd [#allocation8 + $0x4], 32  ;;  %v221_v4 = vld [vmem:[%s644_s5] sm:$0x3] }
  0x17   :  { %222 = vst [vmem:[#allocation7] sm:$0x3] %v221_v4 }
  0x18   :  { %247 = vsyncadd [#allocation8 + $0x5], 32 }
  0x19   :  { %537 = dma.done.wait [#allocation8], 32 }
  0x1a   :  { %538 = vsyncadd [#allocation8], 4294967264  ;;  %v252_v5 = vld [vmem:[#allocation2] sm:$0x1]  ;;  %v253_v6 = vld [vmem:[#allocation2 + $0x1] sm:$0x1] }
  0x1b   :  { %v254_v7 = vsub.f32 1.0, %v252_v5  ;;  %v255_v8 = vsub.f32 1.0, %v253_v6  ;;  %vm258_vm0 = vcmask 319488  }
  0x1d   :  { %v256_v9 = vmul.f32 %v254_v7, %v254_v7  ;;  %v257_v10 = vmul.f32 %v255_v8, %v255_v8 }
  0x1f   :  { %v259_v11 = vsel %vm258_vm0, %v256_v9, 0.0  ;;  %v260_v12 = vsel %vm258_vm0, %v257_v10, 0.0 }
  0x20   :  { %v261_v13 = vadd.f32 %v260_v12, %v259_v11 }
  0x22   :  { %262 = vadd.xlane.f32.xlu0 %v261_v13 }
  0xaf   :  { %v263_v14 = vpop.xlane.xlu0 %262 }
  0xb0   :  { %v264_v15 = vrot.slane %v263_v14, 4 }
  0xb2   :  { %v265_v16 = vadd.f32 %v264_v15, %v263_v14 }
  0xb4   :  { %v266_v17 = vrot.slane %v265_v16, 2 }
  0xb6   :  { %v267_v18 = vadd.f32 %v266_v17, %v265_v16 }
  0xb8   :  { %v268_v19 = vrot.slane %v267_v18, 1 }
  0xba   :  { %v269_v20 = vadd.f32 %v268_v19, %v267_v18 }
  0xbc   :  { %491 = vpush %v269_v20 }
  0xed   :  { %s492_s2 = spop %491 }
  0xee   :  { %s271_s3 = smul.f32 0.0125, %s492_s2 }
  0xef   :  { %539 = dma.done.wait [#allocation8 + $0x1], 32 }
  0xf0   :  { %540 = vsyncadd [#allocation8 + $0x1], 4294967264  ;;  %v275_v21 = vld [vmem:[#allocation3] sm:$0x1]  ;;  %v276_v22 = vld [vmem:[#allocation3 + $0x1] sm:$0x1] }
  0xf1   :  { %v277_v23 = vmul.f32 %v275_v21, %v275_v21  ;;  %v278_v24 = vmul.f32 %v276_v22, %v276_v22 }
  0xf3   :  { %v279_v25 = vsel %vm258_vm0, %v277_v23, 0.0  ;;  %v280_v26 = vsel %vm258_vm0, %v278_v24, 0.0 }
  0xf4   :  { %v281_v27 = vadd.f32 %v280_v26, %v279_v25 }
  0xf6   :  { %282 = vadd.xlane.f32.xlu0 %v281_v27 }
 0x183   :  { %v283_v28 = vpop.xlane.xlu0 %282 }
 0x184   :  { %v284_v29 = vrot.slane %v283_v28, 4 }
 0x186   :  { %v285_v30 = vadd.f32 %v284_v29, %v283_v28 }
 0x188   :  { %v286_v31 = vrot.slane %v285_v30, 2 }
 0x18a   :  { %v287_v32 = vadd.f32 %v286_v31, %v285_v30 }
 0x18c   :  { %v288_v33 = vrot.slane %v287_v32, 1 }
 0x18e   :  { %v289_v34 = vadd.f32 %v288_v33, %v287_v32 }
 0x190   :  { %493 = vpush %v289_v34 }
 0x1c1   :  { %s494_s4 = spop %493 }
 0x1c2   :  { %s291_s5 = smul.f32 0.0125, %s494_s4 }
 0x1c4   :  { %s292_s17 = sadd.f32 %s291_s5, %s271_s3 }
 0x1c5   :  { %541 = dma.done.wait [#allocation8 + $0x2], 32 }
 0x1c6   :  { %542 = vsyncadd [#allocation8 + $0x2], 4294967264  ;;  %v295_v35 = vld [vmem:[#allocation4] sm:$0x1]  ;;  %v296_v36 = vld [vmem:[#allocation4 + $0x1] sm:$0x1] }
 0x1c7   :  { %v297_v37 = vsub.f32 1.0, %v295_v35  ;;  %v298_v38 = vsub.f32 1.0, %v296_v36  ;;  %vm301_vm1 = vcmask 188416  }
 0x1c9   :  { %v299_v39 = vmul.f32 %v297_v37, %v297_v37  ;;  %v300_v40 = vmul.f32 %v298_v38, %v298_v38 }
 0x1cb   :  { %v302_v41 = vsel %vm301_vm1, %v299_v39, 0.0  ;;  %v303_v42 = vsel %vm301_vm1, %v300_v40, 0.0 }
 0x1cc   :  { %v304_v43 = vadd.f32 %v303_v42, %v302_v41 }
 0x1ce   :  { %305 = vadd.xlane.f32.xlu0 %v304_v43 }
 0x25b   :  { %v306_v44 = vpop.xlane.xlu0 %305 }
 0x25c   :  { %v307_v45 = vrot.slane %v306_v44, 4 }
 0x25e   :  { %v308_v46 = vadd.f32 %v307_v45, %v306_v44 }
 0x260   :  { %v309_v47 = vrot.slane %v308_v46, 2 }
 0x262   :  { %v310_v48 = vadd.f32 %v309_v47, %v308_v46 }
 0x264   :  { %v311_v49 = vrot.slane %v310_v48, 1 }
 0x266   :  { %v312_v50 = vadd.f32 %v311_v49, %v310_v48 }
 0x268   :  { %495 = vpush %v312_v50 }
 0x299   :  { %s496_s18 = spop %495 }
 0x29a   :  { %s314_s19 = smul.f32 0.020833334, %s496_s18 }
 0x29c   :  { %s315_s20 = sadd.f32 %s314_s19, %s292_s17 }
 0x29d   :  { %543 = dma.done.wait [#allocation8 + $0x3], 32 }
 0x29e   :  { %544 = vsyncadd [#allocation8 + $0x3], 4294967264  ;;  %v318_v51 = vld [vmem:[#allocation5] sm:$0x1]  ;;  %v319_v52 = vld [vmem:[#allocation5 + $0x1] sm:$0x1] }
 0x29f   :  { %v320_v53 = vmul.f32 %v318_v51, %v318_v51  ;;  %v321_v54 = vmul.f32 %v319_v52, %v319_v52 }
 0x2a1   :  { %v322_v55 = vsel %vm301_vm1, %v320_v53, 0.0  ;;  %v323_v56 = vsel %vm301_vm1, %v321_v54, 0.0 }
 0x2a2   :  { %v324_v57 = vadd.f32 %v323_v56, %v322_v55 }
 0x2a4   :  { %325 = vadd.xlane.f32.xlu0 %v324_v57 }
 0x331   :  { %v326_v58 = vpop.xlane.xlu0 %325 }
 0x332   :  { %v327_v59 = vrot.slane %v326_v58, 4 }
 0x334   :  { %v328_v60 = vadd.f32 %v327_v59, %v326_v58 }
 0x336   :  { %v329_v61 = vrot.slane %v328_v60, 2 }
 0x338   :  { %v330_v62 = vadd.f32 %v329_v61, %v328_v60 }
 0x33a   :  { %v331_v63 = vrot.slane %v330_v62, 1 }
 0x33c   :  { %v332_v0 = vadd.f32 %v331_v63, %v330_v62 }
 0x33e   :  { %497 = vpush %v332_v0 }
 0x36f   :  { %s498_s21 = spop %497 }
 0x370   :  { %s334_s22 = smul.f32 0.020833334, %s498_s21 }
 0x372   :  { %s335_s23 = sadd.f32 %s334_s22, %s315_s20 }
 0x373   :  { %545 = dma.done.wait [#allocation8 + $0x4], 32 }
 0x374   :  { %546 = vsyncadd [#allocation8 + $0x4], 4294967264  ;;  %v338_v1 = vld [vmem:[#allocation6] sm:$0x1]  ;;  %v339_v2 = vld [vmem:[#allocation6 + $0x1] sm:$0x1] }
 0x375   :  { %v340_v3 = vsub.f32 1.0, %v338_v1  ;;  %v341_v4 = vsub.f32 1.0, %v339_v2  ;;  %vm344_vm2 = vcmask 122880  }
 0x377   :  { %v342_v5 = vmul.f32 %v340_v3, %v340_v3  ;;  %v343_v6 = vmul.f32 %v341_v4, %v341_v4 }
 0x379   :  { %v345_v7 = vsel %vm344_vm2, %v342_v5, 0.0  ;;  %v346_v8 = vsel %vm344_vm2, %v343_v6, 0.0 }
 0x37a   :  { %v347_v9 = vadd.f32 %v346_v8, %v345_v7 }
 0x37c   :  { %348 = vadd.xlane.f32.xlu0 %v347_v9 }
 0x409   :  { %v349_v10 = vpop.xlane.xlu0 %348 }
 0x40a   :  { %v350_v11 = vrot.slane %v349_v10, 4 }
 0x40c   :  { %v351_v12 = vadd.f32 %v350_v11, %v349_v10 }
 0x40e   :  { %v352_v13 = vrot.slane %v351_v12, 2 }
 0x410   :  { %v353_v14 = vadd.f32 %v352_v13, %v351_v12 }
 0x412   :  { %v354_v15 = vrot.slane %v353_v14, 1 }
 0x414   :  { %v355_v16 = vadd.f32 %v354_v15, %v353_v14 }
 0x416   :  { %499 = vpush %v355_v16 }
 0x447   :  { %s500_s24 = spop %499 }
 0x448   :  { %s357_s25 = smul.f32 0.03125, %s500_s24 }
 0x44a   :  { %s358_s26 = sadd.f32 %s357_s25, %s335_s23 }
 0x44b   :  { %547 = dma.done.wait [#allocation8 + $0x5], 32 }
 0x44c   :  { %548 = vsyncadd [#allocation8 + $0x5], 4294967264  ;;  %v361_v17 = vld [vmem:[#allocation7] sm:$0x1]  ;;  %v362_v18 = vld [vmem:[#allocation7 + $0x1] sm:$0x1] }
 0x44d   :  { %v363_v19 = vmul.f32 %v361_v17, %v361_v17  ;;  %v364_v20 = vmul.f32 %v362_v18, %v362_v18  ;;  %s527_s8 = scalar_lea.hbm %s645_s6, 16 }
 0x44e   :  { %p528_p8 = scmp.ne.s32.totalorder %s645_s6, %s527_s8  ;;  %p531_p9 = scmp.lt.u32.totalorder %s527_s8, %s645_s6 }
 0x44f   :  { %v365_v21 = vsel %vm344_vm2, %v363_v19, 0.0  ;;  %v366_v22 = vsel %vm344_vm2, %v364_v20, 0.0 }
 0x450   :  { %v367_v23 = vadd.f32 %v366_v22, %v365_v21  ;;  %p533_p10 = pnand %p531_p9, %p528_p8 }
 0x452   :  { %368 = vadd.xlane.f32.xlu0 %v367_v23 }
 0x4df   :  { %v369_v24 = vpop.xlane.xlu0 %368 }
 0x4e0   :  { %v370_v25 = vrot.slane %v369_v24, 4 }
 0x4e2   :  { %v371_v26 = vadd.f32 %v370_v25, %v369_v24 }
 0x4e4   :  { %v372_v27 = vrot.slane %v371_v26, 2 }
 0x4e6   :  { %v373_v28 = vadd.f32 %v372_v27, %v371_v26 }
 0x4e8   :  { %v374_v29 = vrot.slane %v373_v28, 1 }
 0x4ea   :  { %v375_v30 = vadd.f32 %v374_v29, %v373_v28 }
 0x4ec   :  { %501 = vpush %v375_v30 }
 0x51d   :  { %s502_s27 = spop %501 }
 0x51e   :  { %s377_s28 = smul.f32 0.03125, %s502_s27 }
 0x520   :  { %s378_s29 = sadd.f32 %s377_s28, %s358_s26 }
 0x522   :  { %380 = sst [smem:[#allocation9]] %s378_s29 }
 0x523   :  { %536 = shalt.err (!%p533_p10)
}
 0x524   :  { %s552_s12 = smov [#allocation9]  }
 0x525   :  { %388 = dma.smem_to_hbm %s552_s12, 16, %s645_s6, [#allocation10]  }
 0x526   :  { %549 = dma.done.wait [#allocation10], 16  }
 0x527   :  { %550 = vsyncadd [#allocation10], 4294967280 }
 0x528   :  { %392 = sfence }
 0x529   :  { %393 = vsyncpa [#allocation10], 1 }
 0x52a   :  { %394 = vsyncmov [#allocation8] }
 0x52d   :  { %s395_s15 = vpop.sfrf %394 }
 0x52e   :  { %p485_p11 = scmp.ne.s32.totalorder %s395_s15, 0 }
 0x530   :  { %399 = shalt.err (%p485_p11)  }
 0x531   :  { %401 = vsyncmov [#allocation8 + $0x1] }
 0x534   :  { %s402_s0 = vpop.sfrf %401 }
 0x535   :  { %p486_p12 = scmp.ne.s32.totalorder %s402_s0, 0 }
 0x537   :  { %406 = shalt.err (%p486_p12)  }
 0x538   :  { %408 = vsyncmov [#allocation8 + $0x2] }
 0x53b   :  { %s409_s16 = vpop.sfrf %408 }
 0x53c   :  { %p487_p13 = scmp.ne.s32.totalorder %s409_s16, 0 }
 0x53e   :  { %413 = shalt.err (%p487_p13)  }
 0x53f   :  { %415 = vsyncmov [#allocation8 + $0x3] }
 0x542   :  { %s416_s2 = vpop.sfrf %415 }
 0x543   :  { %p488_p0 = scmp.ne.s32.totalorder %s416_s2, 0 }
 0x545   :  { %420 = shalt.err (%p488_p0)  }
 0x546   :  { %422 = vsyncmov [#allocation8 + $0x4] }
 0x549   :  { %s423_s6 = vpop.sfrf %422 }
 0x54a   :  { %p489_p1 = scmp.ne.s32.totalorder %s423_s6, 0 }
 0x54c   :  { %427 = shalt.err (%p489_p1)  }
 0x54d   :  { %429 = vsyncmov [#allocation8 + $0x5] }
 0x550   :  { %s430_s3 = vpop.sfrf %429 }
 0x551   :  { %p490_p2 = scmp.ne.s32.totalorder %s430_s3, 0 }
 0x553   :  { %434 = shalt.err (%p490_p2)  }

</bundles_post_ra>
